<compile_context>
chip_gen: v5e
topology: v5e:2x2
jax: 0.10.0
libtpu: 0.0.40
codegen_flags: <defaults>
</compile_context>

<pallas_src>
import functools

import jax
import jax.numpy as jnp
from jax.experimental import pallas as pl
from jax.experimental.pallas import tpu as pltpu

EPSILON = 1e-5
_LANE = 128


def _cdiv(a, b):
    return (a + b - 1) // b


def _vmem_budget():
    """Return (target_block_elems, vmem_limit_bytes) based on physical VMEM."""
    cap = None
    try:
        cap = int(pltpu.get_tpu_info().vmem_capacity_bytes)
    except Exception:
        cap = None
    if cap is not None and cap >= 100 * 1024 * 1024:
        # v5e / v6e: 128 MiB VMEM -> 8 MiB per input per step.
        return 2 << 20, 64 * 1024 * 1024
    # v7x (64 MiB VMEM) or unknown: stay conservative, 4 MiB per input per step.
    return 1 << 20, 40 * 1024 * 1024


def _dice_sums_kernel(pred_ref, tar_ref, inter_ref, union_ref, *,
                      block_rows, strip_rows, acc_rows, rows,
                      steps_per_split, ragged, unroll):
    """Accumulate per-lane sums of sigmoid(p)*t and sigmoid(p)+t."""
    s = pl.program_id(0)
    k = pl.program_id(1)

    @pl.when(k == 0)
    def _():
        inter_ref[...] = jnp.zeros_like(inter_ref)
        union_ref[...] = jnp.zeros_like(union_ref)

    n_strips = block_rows // strip_rows
    fold = strip_rows // 8 if strip_rows % 8 == 0 else 1

    def strip_sums(start, masked, row0):
        p = pred_ref[pl.ds(start, strip_rows), :].astype(jnp.float32)
        t = tar_ref[pl.ds(start, strip_rows), :].astype(jnp.float32)
        # sigmoid(x) = 0.5*tanh(x/2) + 0.5 -> single EUP push (vs exp + recip).
        p = 0.5 * jnp.tanh(0.5 * p) + 0.5
        ii = p * t
        uu = p + t
        if masked:
            # Only traced for kernels with a ragged/over-provisioned tail, and
            # only executed on that final block (see pl.when below).
            r = jax.lax.broadcasted_iota(jnp.int32, (strip_rows, _LANE), 0)
            keep = (r + start) + row0 < rows
            ii = jnp.where(keep, ii, 0.0)
            uu = jnp.where(keep, uu, 0.0)
        if fold > 1:
            # Sublane-group fold to (8, lane): layout-preserving, pure VPU adds.
            ii = ii.reshape(fold, 8, _LANE).sum(axis=0)
            uu = uu.reshape(fold, 8, _LANE).sum(axis=0)
        return ii, uu

    def accumulate(masked, row0):
        if n_strips == 1:
            acc_i, acc_u = strip_sums(0, masked, row0)
        else:
            def body(idx, carry):
                ci, cu = carry
                start = pl.multiple_of(idx * strip_rows, strip_rows)
                ii, uu = strip_sums(start, masked, row0)
                return ci + ii, cu + uu

            zero = jnp.zeros((acc_rows, _LANE), jnp.float32)
            acc_i, acc_u = jax.lax.fori_loop(0, n_strips, body, (zero, zero),
                                             unroll=unroll)
        inter_ref[...] += acc_i
        union_ref[...] += acc_u

    if ragged:
        b = s * steps_per_split + k          # logical block index (unclamped)
        row0 = b * block_rows

        @pl.when(row0 + block_rows <= rows)  # full block: no mask work at all
        def _():
            accumulate(False, row0)

        @pl.when(row0 + block_rows > rows)   # ragged or fully out-of-range block
        def _():
            accumulate(True, row0)
    else:
        accumulate(False, 0)


def dice_loss(predict, target, *, block_rows=None, n_split=None):
    """Pallas implementation of DiceLoss.forward. Returns a float32 scalar."""
    assert predict.shape == target.shape, (
        "the size of predict and target must be equal.")

    total = 1
    for d in predict.shape:
        total *= int(d)

    pred_flat = predict.reshape(-1)
    tar_flat = target.reshape(-1)

    rows = total // _LANE
    aligned = rows * _LANE
    rem = total - aligned

    # < 128 leftover elements: fold them in with plain JAX (negligible work)
    # instead of materializing padded copies of both inputs.
    inter_tail = jnp.float32(0.0)
    union_tail = jnp.float32(0.0)
    if rem:
        p_tail = jax.nn.sigmoid(pred_flat[aligned:].astype(jnp.float32))
        t_tail = tar_flat[aligned:].astype(jnp.float32)
        inter_tail = jnp.sum(p_tail * t_tail)
        union_tail = jnp.sum(p_tail + t_tail)

    if rows == 0:  # tiny input: nothing left for the kernel
        return 1.0 - 2.0 * (inter_tail + EPSILON) / (union_tail + EPSILON)

    if rem:
        # TODO(synk): pass the un-sliced flat arrays with memory_space=pl.ANY +
        # manual DMA so the ragged path is fully copy-free too.
        pred2 = pred_flat[:aligned].reshape(rows, _LANE)
        tar2 = tar_flat[:aligned].reshape(rows, _LANE)
    else:
        pred2 = pred_flat.reshape(rows, _LANE)     # free reshape, no copy
        tar2 = tar_flat.reshape(rows, _LANE)

    # Row alignment follows the narrowest input dtype (packed sublane tiles).
    itemsize = min(predict.dtype.itemsize, target.dtype.itemsize)
    row_align = 8 * max(1, 4 // itemsize)          # 8 f32, 16 bf16, 32 int8

    target_block_elems, vmem_limit = _vmem_budget()
    target_rows = max(row_align,
                      (target_block_elems // _LANE) // row_align * row_align)

    if block_rows is None:
        if rows <= target_rows:
            block_rows = rows
        else:
            # Prefer a block size that divides rows exactly (no mask path).
            block_rows = 0
            for cand in range(target_rows, 0, -row_align):
                if rows % cand == 0:
                    block_rows = cand
                    break
            if block_rows < max(row_align, target_rows // 4):
                block_rows = target_rows           # ragged tail, masked in-kernel
    block_rows = min(block_rows, rows)
    assert block_rows == rows or block_rows % row_align == 0, block_rows

    num_blocks = _cdiv(rows, block_rows)
    if n_split is None:
        n_split = 2 if num_blocks >= 2 else 1      # shard across v7x's 2 TCs
    n_split = max(1, min(n_split, num_blocks))
    steps = _cdiv(num_blocks, n_split)
    ragged = (rows % block_rows != 0) or (num_blocks != n_split * steps)

    # Strip size: keep per-strip temporaries to a few vregs.
    if block_rows % row_align != 0:
        strip_rows = block_rows                    # single (full-block) strip
    else:
        strip_rows = block_rows
        for cand in (4 * row_align, 3 * row_align, 2 * row_align, row_align):
            if cand < block_rows and block_rows % cand == 0:
                strip_rows = cand
                break
    n_strips = block_rows // strip_rows
    acc_rows = 8 if strip_rows % 8 == 0 else strip_rows
    unroll = min(4, n_strips)

    last_block = num_blocks - 1
    if num_blocks == n_split * steps:
        def in_index_map(s, k):
            return (s * steps + k, 0)
    else:
        def in_index_map(s, k):
            return (jnp.minimum(s * steps + k, last_block), 0)

    def out_index_map(s, k):
        return (s, 0, 0)

    kernel = functools.partial(
        _dice_sums_kernel,
        block_rows=block_rows, strip_rows=strip_rows, acc_rows=acc_rows,
        rows=rows, steps_per_split=steps, ragged=ragged, unroll=unroll)

    out_sds = jax.ShapeDtypeStruct((n_split, acc_rows, _LANE), jnp.float32)
    inter_p, union_p = pl.pallas_call(
        kernel,
        out_shape=(out_sds, out_sds),
        grid_spec=pltpu.PrefetchScalarGridSpec(
            num_scalar_prefetch=0,
            grid=(n_split, steps),
            in_specs=[
                pl.BlockSpec((block_rows, _LANE), in_index_map),
                pl.BlockSpec((block_rows, _LANE), in_index_map),
            ],
            out_specs=(
                pl.BlockSpec((None, acc_rows, _LANE), out_index_map),
                pl.BlockSpec((None, acc_rows, _LANE), out_index_map),
            ),
        ),
        compiler_params=pltpu.CompilerParams(
            dimension_semantics=("parallel", "arbitrary"),
            vmem_limit_bytes=vmem_limit,
        ),
    )(pred2, tar2)

    inter = jnp.sum(inter_p) + inter_tail
    union = jnp.sum(union_p) + union_tail
    return 1.0 - 2.0 * (inter + EPSILON) / (union + EPSILON)


def dice_loss_ref(predict, target):
    """Pure-JAX reference mirroring the PyTorch module."""
    num = predict.shape[0]
    pre = jax.nn.sigmoid(predict.astype(jnp.float32)).reshape(num, -1)
    tar = target.astype(jnp.float32).reshape(num, -1)
    intersection = (pre * tar).sum(-1).sum()
    union = (pre + tar).sum(-1).sum()
    return 1.0 - 2.0 * (intersection + EPSILON) / (union + EPSILON)


if __name__ == "__main__":
    key = jax.random.PRNGKey(0)

    def make_inputs(k, shape, dtype=jnp.float32):
        k1, k2 = jax.random.split(k)
        p = jax.random.normal(k1, shape, dtype=jnp.float32).astype(dtype)
        t = (jax.random.uniform(k2, shape) > 0.5).astype(dtype)
        return p, t

    # Main case: NCHW segmentation logits / binary mask.
    predict, target = make_inputs(key, (2, 4, 16, 16))
    out = jax.block_until_ready(dice_loss(predict, target))
    ref = dice_loss_ref(predict, target)
    assert jnp.allclose(out, ref, atol=1e-5, rtol=1e-5), (out, ref)

    # Extra coverage of the tiling paths, forced small via overrides:
    #   - JAX-tail path (total not divisible by 128, no padded copies)
    #   - exact two-way split across blocks (no mask code traced)
    #   - ragged last block (masked pl.when branch)
    #   - uneven block/split count (clamped + fully masked extra block)
    #   - bf16 inputs (narrow-dtype HBM-traffic path)
    cases = [
        ((2, 3, 7, 5), dict()),
        ((2, 4, 16, 16), dict(block_rows=8, n_split=2)),
        ((2, 3, 16, 16), dict(block_rows=8, n_split=2)),
        ((2, 6, 16, 16), dict(block_rows=8, n_split=2)),
        ((2, 4, 16, 16), dict(dtype=jnp.bfloat16)),
    ]
    for i, (shape, kwargs) in enumerate(cases):
        kwargs = dict(kwargs)
        dtype = kwargs.pop("dtype", jnp.float32)
        p, t = make_inputs(jax.random.fold_in(key, i + 1), shape, dtype)
        o = jax.block_until_ready(dice_loss(p, t, **kwargs))
        r = dice_loss_ref(p, t)
        assert jnp.allclose(o, r, atol=1e-5, rtol=1e-5), (shape, kwargs, o, r)

    print("KERNEL_OK")
</pallas_src>

<mosaic_0001>
module attributes {stable_mosaic.version = 11 : i64} {
  func.func @_dice_sums_kernel(%arg0: i32, %arg1: i32, %arg2: memref<16x128xf32, #tpu.memory_space<vmem>>, %arg3: memref<16x128xf32, #tpu.memory_space<vmem>>, %arg4: memref<1x8x128xf32, #tpu.memory_space<vmem>>, %arg5: memref<1x8x128xf32, #tpu.memory_space<vmem>>) attributes {dimension_semantics = [#tpu.dimension_semantics<parallel>, #tpu.dimension_semantics<arbitrary>], iteration_bounds = array<i64: 1, 1>, scalar_prefetch = 0 : i64, scratch_operands = 0 : i64, tpu.core_type = #tpu.core_type<tc>, window_params = [{transform_indices = @transform_0, window_bounds = array<i64: 16, 128>}, {transform_indices = @transform_1, window_bounds = array<i64: 16, 128>}, {transform_indices = @transform_2, window_bounds = array<i64: 1, 8, 128>}, {transform_indices = @transform_3, window_bounds = array<i64: 1, 8, 128>}]} {
    %c0_i32 = arith.constant 0 : i32
    %0 = arith.cmpi eq, %arg1, %c0_i32 : i32
    %1 = arith.extui %0 : i1 to i32
    %c0_i32_0 = arith.constant 0 : i32
    %2 = arith.cmpi ne, %1, %c0_i32_0 : i32
    scf.if %2 {
      %cst_24 = arith.constant 0.000000e+00 : f32
      %50 = vector.broadcast %cst_24 : f32 to vector<8x128xf32>
      %c0_25 = arith.constant 0 : index
      %c0_26 = arith.constant 0 : index
      %c0_27 = arith.constant 0 : index
      %51 = vector.load %arg4[%c0_25, %c0_26, %c0_27] : memref<1x8x128xf32, #tpu.memory_space<vmem>>, vector<1x8x128xf32>
      %52 = vector.shape_cast %51 : vector<1x8x128xf32> to vector<8x128xf32>
      %53 = vector.shape_cast %50 : vector<8x128xf32> to vector<1x8x128xf32>
      tpu.vector_store %arg4[%c0_25, %c0_26, %c0_27], %53 {strides = array<i32>} : memref<1x8x128xf32, #tpu.memory_space<vmem>>, vector<1x8x128xf32>,
      %cst_28 = arith.constant 0.000000e+00 : f32
      %54 = vector.broadcast %cst_28 : f32 to vector<8x128xf32>
      %c0_29 = arith.constant 0 : index
      %c0_30 = arith.constant 0 : index
      %c0_31 = arith.constant 0 : index
      %55 = vector.load %arg5[%c0_29, %c0_30, %c0_31] : memref<1x8x128xf32, #tpu.memory_space<vmem>>, vector<1x8x128xf32>
      %56 = vector.shape_cast %55 : vector<1x8x128xf32> to vector<8x128xf32>
      %57 = vector.shape_cast %54 : vector<8x128xf32> to vector<1x8x128xf32>
      tpu.vector_store %arg5[%c0_29, %c0_30, %c0_31], %57 {strides = array<i32>} : memref<1x8x128xf32, #tpu.memory_space<vmem>>, vector<1x8x128xf32>,
    } else {
    }
    %cst = arith.constant 0.000000e+00 : f32
    %3 = vector.broadcast %cst : f32 to vector<8x128xf32>
    %c0_i32_1 = arith.constant 0 : i32
    %c8_i32 = arith.constant 8 : i32
    %4 = arith.muli %c0_i32_1, %c8_i32 : i32
    %5 = tpu.assume_multiple %4, 8 : i32
    %6 = arith.index_cast %5 : i32 to index
    %c0 = arith.constant 0 : index
    %7 = vector.load %arg2[%6, %c0] : memref<16x128xf32, #tpu.memory_space<vmem>>, vector<8x128xf32>
    %8 = arith.index_cast %5 : i32 to index
    %c0_2 = arith.constant 0 : index
    %9 = vector.load %arg3[%8, %c0_2] : memref<16x128xf32, #tpu.memory_space<vmem>>, vector<8x128xf32>
    %cst_3 = arith.constant 5.000000e-01 : f32
    %10 = vector.broadcast %cst_3 : f32 to vector<8x128xf32>
    %11 = arith.mulf %10, %7 : vector<8x128xf32>
    %12 = math.tanh %11 : vector<8x128xf32>
    %cst_4 = arith.constant 5.000000e-01 : f32
    %13 = vector.broadcast %cst_4 : f32 to vector<8x128xf32>
    %14 = arith.mulf %13, %12 : vector<8x128xf32>
    %cst_5 = arith.constant 5.000000e-01 : f32
    %15 = vector.broadcast %cst_5 : f32 to vector<8x128xf32>
    %16 = arith.addf %14, %15 : vector<8x128xf32>
    %17 = arith.mulf %16, %9 : vector<8x128xf32>
    %18 = arith.addf %16, %9 : vector<8x128xf32>
    %19 = arith.addf %3, %17 : vector<8x128xf32>
    %20 = arith.addf %3, %18 : vector<8x128xf32>
    %c1_i32 = arith.constant 1 : i32
    %c8_i32_6 = arith.constant 8 : i32
    %21 = arith.muli %c1_i32, %c8_i32_6 : i32
    %22 = tpu.assume_multiple %21, 8 : i32
    %23 = arith.index_cast %22 : i32 to index
    %c0_7 = arith.constant 0 : index
    %24 = vector.load %arg2[%23, %c0_7] : memref<16x128xf32, #tpu.memory_space<vmem>>, vector<8x128xf32>
    %25 = arith.index_cast %22 : i32 to index
    %c0_8 = arith.constant 0 : index
    %26 = vector.load %arg3[%25, %c0_8] : memref<16x128xf32, #tpu.memory_space<vmem>>, vector<8x128xf32>
    %cst_9 = arith.constant 5.000000e-01 : f32
    %27 = vector.broadcast %cst_9 : f32 to vector<8x128xf32>
    %28 = arith.mulf %27, %24 : vector<8x128xf32>
    %29 = math.tanh %28 : vector<8x128xf32>
    %cst_10 = arith.constant 5.000000e-01 : f32
    %30 = vector.broadcast %cst_10 : f32 to vector<8x128xf32>
    %31 = arith.mulf %30, %29 : vector<8x128xf32>
    %cst_11 = arith.constant 5.000000e-01 : f32
    %32 = vector.broadcast %cst_11 : f32 to vector<8x128xf32>
    %33 = arith.addf %31, %32 : vector<8x128xf32>
    %34 = arith.mulf %33, %26 : vector<8x128xf32>
    %35 = arith.addf %33, %26 : vector<8x128xf32>
    %36 = arith.addf %19, %34 : vector<8x128xf32>
    %37 = arith.addf %20, %35 : vector<8x128xf32>
    %c2_i32 = arith.constant 2 : i32
    %c0_12 = arith.constant 0 : index
    %c0_13 = arith.constant 0 : index
    %c0_14 = arith.constant 0 : index
    %38 = vector.load %arg4[%c0_12, %c0_13, %c0_14] : memref<1x8x128xf32, #tpu.memory_space<vmem>>, vector<1x8x128xf32>
    %39 = vector.shape_cast %38 : vector<1x8x128xf32> to vector<8x128xf32>
    %40 = arith.addf %39, %36 : vector<8x128xf32>
    %c0_15 = arith.constant 0 : index
    %c0_16 = arith.constant 0 : index
    %c0_17 = arith.constant 0 : index
    %41 = vector.load %arg4[%c0_15, %c0_16, %c0_17] : memref<1x8x128xf32, #tpu.memory_space<vmem>>, vector<1x8x128xf32>
    %42 = vector.shape_cast %41 : vector<1x8x128xf32> to vector<8x128xf32>
    %43 = vector.shape_cast %40 : vector<8x128xf32> to vector<1x8x128xf32>
    tpu.vector_store %arg4[%c0_15, %c0_16, %c0_17], %43 {strides = array<i32>} : memref<1x8x128xf32, #tpu.memory_space<vmem>>, vector<1x8x128xf32>,
    %c0_18 = arith.constant 0 : index
    %c0_19 = arith.constant 0 : index
    %c0_20 = arith.constant 0 : index
    %44 = vector.load %arg5[%c0_18, %c0_19, %c0_20] : memref<1x8x128xf32, #tpu.memory_space<vmem>>, vector<1x8x128xf32>
    %45 = vector.shape_cast %44 : vector<1x8x128xf32> to vector<8x128xf32>
    %46 = arith.addf %45, %37 : vector<8x128xf32>
    %c0_21 = arith.constant 0 : index
    %c0_22 = arith.constant 0 : index
    %c0_23 = arith.constant 0 : index
    %47 = vector.load %arg5[%c0_21, %c0_22, %c0_23] : memref<1x8x128xf32, #tpu.memory_space<vmem>>, vector<1x8x128xf32>
    %48 = vector.shape_cast %47 : vector<1x8x128xf32> to vector<8x128xf32>
    %49 = vector.shape_cast %46 : vector<8x128xf32> to vector<1x8x128xf32>
    tpu.vector_store %arg5[%c0_21, %c0_22, %c0_23], %49 {strides = array<i32>} : memref<1x8x128xf32, #tpu.memory_space<vmem>>, vector<1x8x128xf32>,
    return
  }
  func.func @transform_0(%arg0: i32, %arg1: i32) -> (i32, i32) {
    %c1_i32 = arith.constant 1 : i32
    %0 = arith.muli %arg0, %c1_i32 : i32
    %1 = arith.addi %0, %arg1 : i32
    %c0_i32 = arith.constant 0 : i32
    %c0_i32_0 = arith.constant 0 : i32
    return %1, %c0_i32 : i32, i32
  }
  func.func @transform_1(%arg0: i32, %arg1: i32) -> (i32, i32) {
    %c1_i32 = arith.constant 1 : i32
    %0 = arith.muli %arg0, %c1_i32 : i32
    %1 = arith.addi %0, %arg1 : i32
    %c0_i32 = arith.constant 0 : i32
    %c0_i32_0 = arith.constant 0 : i32
    return %1, %c0_i32 : i32, i32
  }
  func.func @transform_2(%arg0: i32, %arg1: i32) -> (i32, i32, i32) {
    %c0_i32 = arith.constant 0 : i32
    %c0_i32_0 = arith.constant 0 : i32
    %c0_i32_1 = arith.constant 0 : i32
    return %arg0, %c0_i32, %c0_i32_0 : i32, i32, i32
  }
  func.func @transform_3(%arg0: i32, %arg1: i32) -> (i32, i32, i32) {
    %c0_i32 = arith.constant 0 : i32
    %c0_i32_0 = arith.constant 0 : i32
    %c0_i32_1 = arith.constant 0 : i32
    return %arg0, %c0_i32, %c0_i32_0 : i32, i32, i32
  }
}

</mosaic_0001>

<bundles_post_ra>
// kernel: tpu_custom_call.1
= control target key start
LH: loop header
LB: loop body
LE: loop exit
PB: predicated region body
PF: predicated region fallthrough
CT: control target
= control target key end

     0   :  { %9 = vsyncpa [#allocation3], 0  ;;  %s280_s0 = inlined_call_operand.hbm [shape: f32[16,128], index: 0, kind: input, shape index: {}]   ;;  %s281_s1 = inlined_call_operand.hbm [shape: f32[16,128], index: 1, kind: input, shape index: {}]   ;;  %s282_s2 = inlined_call_operand.hbm [shape: f32[1,8,128], index: 2, kind: output, shape index: {0}]   ;;  %s283_s3 = inlined_call_operand.hbm [shape: f32[1,8,128], index: 3, kind: output, shape index: {1}]  }
   0x1   :  { %10 = vsyncpa [#allocation6], 0 }
   0x2   :  { %11 = vsyncpa [#allocation4], 0 }
   0x3   :  { %12 = vsyncpa [#allocation9], 0  ;;  %s21_s14 = sshll.u32 %s280_s0, 4  ;;  %s242_s15 = smov [#allocation2]   ;;  %s22_s14 = int_to_ptr.hbm [resolvable:$true] %s21_s14 }
   0x4   :  { %s23_s16 = sshll.u32 %s242_s15, 4  ;;  %s38_s19 = sshll.u32 %s281_s1, 4  ;;  %s24_s16 = int_to_ptr.vmem [resolvable:$true] %s23_s16  ;;  %s39_s19 = int_to_ptr.hbm [resolvable:$true] %s38_s19 }
   0x5   :  { %s243_s20 = smov 128   ;;  %s244_s21 = smov 8  }
   0x6   :  { %29 = dma.hbm_to_vmem [thread:$0]  %s22_s14, 256, %s24_s16, [#allocation3], %s243_s20, %s243_s20, %s244_s21  }
   0x7   :  { %s245_s22 = smov [#allocation5]  }
   0x8   :  { %s40_s23 = sshll.u32 %s245_s22, 4  ;;  %s41_s23 = int_to_ptr.vmem [resolvable:$true] %s40_s23 }
   0x9   :  { %46 = dma.hbm_to_vmem [thread:$0]  %s39_s19, 256, %s41_s23, [#allocation6], %s243_s20, %s243_s20, %s244_s21  }
   0xa   :  { %234 = dma.done.wait [#allocation3], 256  }
   0xb   :  { %235 = vsyncadd [#allocation3], 4294967040 }
   0xc   :  { %236 = dma.done.wait [#allocation6], 256  }
   0xd   :  { %237 = vsyncadd [#allocation6], 4294967040  ;;  %v65_v0 = vld [vmem:[#allocation2] sm:$0xff]  ;;  %v76_v1 = vld [vmem:[#allocation2 + $0x8] sm:$0xff]  ;;  %s246_s0 = smov [#allocation7]   ;;  %s100_s26 = sshll.u32 %s282_s2, 4  ;;  %s101_s26 = int_to_ptr.hbm [resolvable:$true] %s100_s26 }
   0xe   :  { %v67_v2 = vmul.f32 0.5, %v65_v0  ;;  %v79_v3 = vmul.f32 0.5, %v76_v1  ;;  %v66_v7 = vld [vmem:[#allocation5] sm:$0xff]  ;;  %v78_v10 = vld [vmem:[#allocation5 + $0x8] sm:$0xff]  ;;  %s98_s1 = sshll.u32 %s246_s0, 4  ;;  %s247_s27 = smov [#allocation8]   ;;  %s99_s1 = int_to_ptr.vmem [resolvable:$true] %s98_s1 }
   0xf   :  { %s109_s28 = sshll.u32 %s247_s27, 4  ;;  %s111_s4 = sshll.u32 %s283_s3, 4  ;;  %s110_s28 = int_to_ptr.vmem [resolvable:$true] %s109_s28  ;;  %s112_s4 = int_to_ptr.hbm [resolvable:$true] %s111_s4 }
  0x10   :  { %134 = vtanh.f32 %v67_v2 }
  0x11   :  { %136 = vtanh.f32 %v79_v3 }
  0x16   :  { %v135_v4 = vpop.eup %134 }
  0x17   :  { %v137_v5 = vpop.eup %136  ;;  %v69_v6 = vmul.f32 0.5, %v135_v4 }
  0x18   :  { %v81_v8 = vmul.f32 0.5, %v137_v5 }
  0x19   :  { %v70_v9 = vadd.f32 0.5, %v69_v6 }
  0x1a   :  { %v82_v11 = vadd.f32 0.5, %v81_v8 }
  0x1b   :  { %v71_v12 = vmul.f32 %v70_v9, %v66_v7  ;;  %v72_v13 = vadd.f32 %v70_v9, %v66_v7 }
  0x1c   :  { %v83_v14 = vmul.f32 %v82_v11, %v78_v10  ;;  %v84_v15 = vadd.f32 %v82_v11, %v78_v10 }
  0x1e   :  { %v85_v16 = vadd.f32 %v83_v14, %v71_v12  ;;  %v86_v17 = vadd.f32 %v84_v15, %v72_v13 }
  0x20   :  { %89 = vst [vmem:[#allocation7] sm:$0xff] %v85_v16 }
  0x21   :  { %92 = vst [vmem:[#allocation8] sm:$0xff] %v86_v17  ;;  %103 = dma.vmem_to_hbm [thread:$0]  %s99_s1, 128, %s101_s26, [#allocation4]  }
  0x22   :  { %114 = dma.vmem_to_hbm [thread:$0]  %s110_s28, 128, %s112_s4, [#allocation9]  }
  0x23   :  { %238 = dma.done.wait [#allocation4], 128  }
  0x24   :  { %239 = vsyncadd [#allocation4], 4294967168 }
  0x25   :  { %240 = dma.done.wait [#allocation9], 128  }
  0x26   :  { %241 = vsyncadd [#allocation9], 4294967168 }
  0x27   :  { %123 = vsyncpa [#allocation3], 1 }
  0x28   :  { %124 = vsyncpa [#allocation6], 1 }
  0x29   :  { %125 = vsyncpa [#allocation4], 1 }
  0x2a   :  { %126 = vsyncpa [#allocation9], 1 }

</bundles_post_ra>
